<compile_context>
chip_gen: v6e
topology: v6e:2x2x1
jax: 0.10.0
libtpu: 0.0.40
codegen_flags: <defaults>
</compile_context>

<pallas_src>
import functools
from decimal import Decimal, ROUND_HALF_UP

import jax
import jax.numpy as jnp
from jax.experimental import pallas as pl
from jax.experimental.pallas import tpu as pltpu

DECAY = 0.99997
NORM_VALUE = 2.2
INV_NORM = 1.0 / NORM_VALUE
LANE = 128
_MAX_TILE_LANES = 2048

# ---------------------------------------------------------------------------
# Synthetic, deterministic replacement for the E2B.json content.
# round_to_nearest_half() (despite its name) quantizes to one decimal place
# (Decimal('0.5') has exponent -1) and clamps to [0.05, 1], so after *100 the
# only reachable keys are '5.0', '10.0', ..., '100.0'  -> 11 entries.
# ---------------------------------------------------------------------------
_TABLE_KEYS = [5.0] + [10.0 * i for i in range(1, 11)]
CONTENT = {"{:.1f}".format(k): round(0.6 + 0.012 * k, 4) for k in _TABLE_KEYS}
_THRESHOLD_TABLE = tuple(CONTENT["{:.1f}".format(k)] for k in _TABLE_KEYS)


# ---------------------------------------------------------------------------
# In-kernel scalar helpers (compares / selects / int conversions only)
# ---------------------------------------------------------------------------
def _ratio_to_index(r):
    # round_to_nearest_half(): quantize to 1 decimal (half-up), clamp to
    # [0.05, 1].  Folded directly into a table index: 0 -> 0.05 bucket,
    # k -> 0.1*k (k = 1..10).  After the [0, 10] clamp, trunc-toward-zero
    # matches floor for every reachable value, so a plain f32->i32 cast works.
    return jnp.clip((r * 10.0 + 0.5).astype(jnp.int32), 0, 10)


def _lookup_threshold(idx):
    # 1-of-11 constant lookup as a scalar select chain; the table is baked
    # into the kernel (44 real bytes) so there is no table input / DMA at all.
    thr = jnp.float32(_THRESHOLD_TABLE[0])
    for k in range(1, len(_THRESHOLD_TABLE)):
        thr = jnp.where(idx == k, jnp.float32(_THRESHOLD_TABLE[k]), thr)
    return thr


# ---------------------------------------------------------------------------
# Scalar forward kernel (exact module semantics: optional EMA update + gate)
# ---------------------------------------------------------------------------
def _controller_kernel(do_ema, entropy_ref, r1_ref, r2_ref,
                       gate_ref, r1_out_ref, r2_out_ref):
    e = entropy_ref[0]
    r1 = r1_ref[0]
    r2 = r2_ref[0]
    if do_ema:  # static (trace-time) specialization on training/epoch
        cur = (e - 1.2) * INV_NORM
        r1 = r1 * DECAY + (1.0 - DECAY) * cur
        r2 = r2 * DECAY + (1.0 - DECAY) * cur
    r1_out_ref[0] = r1
    r2_out_ref[0] = r2

    thr1 = _lookup_threshold(_ratio_to_index(r1))
    thr2 = _lookup_threshold(_ratio_to_index(r2))

    # gate = 8 if entropy > thr2 ; 4 if entropy <= thr1 ; else 5
    gate = jnp.where(e > thr2, 8, jnp.where(e <= thr1, 4, 5))
    gate_ref[0] = gate.astype(jnp.int32)


@functools.partial(jax.jit, static_argnames=("training", "epoch"))
def controller_forward(entropy, r1, r2, *, training=False, epoch=0):
    """Functional equivalent of TripleGrainEntropyBitControler.forward.

    Returns (gate:int32[1], new_ratito1:f32[1], new_ratito2:f32[1]).
    The ratito outputs carry the (possibly EMA-updated) parameter state and
    are aliased onto the ratito inputs (in-place parameter update).
    """
    entropy = jnp.asarray(entropy, jnp.float32).reshape((1,))
    r1 = jnp.asarray(r1, jnp.float32).reshape((1,))
    r2 = jnp.asarray(r2, jnp.float32).reshape((1,))
    do_ema = bool(training) and int(epoch) <= 1

    smem = pl.BlockSpec(memory_space=pltpu.MemorySpace.SMEM)
    gate, r1n, r2n = pl.pallas_call(
        functools.partial(_controller_kernel, do_ema),
        out_shape=(jax.ShapeDtypeStruct((1,), jnp.int32),
                   jax.ShapeDtypeStruct((1,), jnp.float32),
                   jax.ShapeDtypeStruct((1,), jnp.float32)),
        in_specs=[smem, smem, smem],
        out_specs=(smem, smem, smem),
        input_output_aliases={1: 1, 2: 2},   # r1 -> r1_out, r2 -> r2_out
    )(entropy, r1, r2)
    return gate, r1n, r2n


# ---------------------------------------------------------------------------
# Batched (inference-path) gate kernel: N entropies per call, lane-dense VPU
# ---------------------------------------------------------------------------
def _batched_gate_kernel(r1_ref, r2_ref, entropy_ref, gate_ref):
    thr1 = _lookup_threshold(_ratio_to_index(r1_ref[0]))
    thr2 = _lookup_threshold(_ratio_to_index(r2_ref[0]))
    e = entropy_ref[...]                                     # (rows, TILE) f32
    gate_ref[...] = jnp.where(e > thr2, 8,
                              jnp.where(e <= thr1, 4, 5)).astype(jnp.int32)


def _pick_tile(n):
    # Largest lane-dense tile (multiple of 128) dividing n, capped at 2048.
    for t in (_MAX_TILE_LANES, 1024, 512, 256, 128):
        if n % t == 0:
            return t
    raise ValueError("last dim must be a multiple of 128")


@jax.jit
def controller_gates(entropy_row, r1, r2):
    """Gate decision for a (rows, N) block of entropies (no EMA; N % 128 == 0)."""
    entropy_row = jnp.asarray(entropy_row, jnp.float32)
    assert entropy_row.ndim == 2 and entropy_row.shape[-1] % LANE == 0
    rows, n = entropy_row.shape
    tile = _pick_tile(n)
    r1 = jnp.asarray(r1, jnp.float32).reshape((1,))
    r2 = jnp.asarray(r2, jnp.float32).reshape((1,))

    smem = pl.BlockSpec(memory_space=pltpu.MemorySpace.SMEM)
    return pl.pallas_call(
        _batched_gate_kernel,
        out_shape=jax.ShapeDtypeStruct((rows, n), jnp.int32),
        grid=(n // tile,),
        in_specs=[smem, smem,
                  pl.BlockSpec((rows, tile), lambda i: (0, i))],
        out_specs=pl.BlockSpec((rows, tile), lambda i: (0, i)),
        compiler_params=pltpu.CompilerParams(
            dimension_semantics=("parallel",)),   # v7x: shard across both TCs
    )(r1, r2, entropy_row)


# ---------------------------------------------------------------------------
# Pure-Python reference (mirrors the PyTorch module exactly)
# ---------------------------------------------------------------------------
def _round_to_nearest_half(value):
    d = Decimal(str(value)).quantize(Decimal('0.5'), rounding=ROUND_HALF_UP)
    return max(min(d, 1), Decimal('0.05'))


def reference_forward(entropy, r1, r2, training=False, epoch=0):
    if training and epoch <= 1:
        cur = (entropy - 1.2) / NORM_VALUE
        r1 = r1 * DECAY + (1 - DECAY) * cur
        r2 = r2 * DECAY + (1 - DECAY) * cur
    t1 = CONTENT["{:.1f}".format(float(_round_to_nearest_half(r1)) * 100)]
    t2 = CONTENT["{:.1f}".format(float(_round_to_nearest_half(r2)) * 100)]
    if entropy > t2:
        return 8
    elif entropy <= t1:
        return 4
    else:
        return 5


if __name__ == "__main__":
    key = jax.random.PRNGKey(0)
    # small deterministic scalar inputs (entropy values spanning all 3 branches)
    entropies = jax.random.uniform(key, (6,), minval=0.0, maxval=3.0,
                                   dtype=jnp.float32)
    r1_0, r2_0 = 0.5, 0.9   # nn.Parameter initial values from __init__

    # scalar forward: eval and training(EMA) variants, checked vs reference
    for training, epoch in [(False, 0), (True, 1)]:
        for i in range(entropies.shape[0]):
            e_dev = entropies[i]
            gate, r1n, r2n = controller_forward(e_dev, r1_0, r2_0,
                                                training=training, epoch=epoch)
            gate = jax.block_until_ready(gate)
            g = int(gate[0])
            ref = reference_forward(float(e_dev), r1_0, r2_0,
                                    training=training, epoch=epoch)
            assert g in (4, 5, 8), g
            assert g == ref, (g, ref, float(e_dev), training)

    # batched inference-path gates: 2 rows x 256 lanes in a single pallas_call
    batch = jax.random.uniform(jax.random.PRNGKey(0), (2, 2 * LANE),
                               minval=0.0, maxval=3.0, dtype=jnp.float32)
    gates = jax.block_until_ready(controller_gates(batch, r1_0, r2_0))
    for r in range(batch.shape[0]):
        for j in range(batch.shape[1]):
            ref = reference_forward(float(batch[r, j]), r1_0, r2_0,
                                    training=False, epoch=0)
            assert int(gates[r, j]) == ref, (r, j, int(gates[r, j]), ref)

    print("KERNEL_OK")
</pallas_src>

<mosaic_0001>
module attributes {stable_mosaic.version = 11 : i64} {
  func.func @_controller_kernel(%arg0: memref<1xf32, #tpu.memory_space<smem>>, %arg1: memref<1xf32, #tpu.memory_space<smem>>, %arg2: memref<1xf32, #tpu.memory_space<smem>>, %arg3: memref<1xi32, #tpu.memory_space<smem>>, %arg4: memref<1xf32, #tpu.memory_space<smem>>, %arg5: memref<1xf32, #tpu.memory_space<smem>>) attributes {dimension_semantics = [], scalar_prefetch = 0 : i64, scratch_operands = 0 : i64, tpu.core_type = #tpu.core_type<tc>} {
    %c0 = arith.constant 0 : index
    %0 = memref.load %arg0[%c0] : memref<1xf32, #tpu.memory_space<smem>>
    %c0_0 = arith.constant 0 : index
    %1 = memref.load %arg1[%c0_0] : memref<1xf32, #tpu.memory_space<smem>>
    %c0_1 = arith.constant 0 : index
    %2 = memref.load %arg2[%c0_1] : memref<1xf32, #tpu.memory_space<smem>>
    %c0_2 = arith.constant 0 : index
    %3 = memref.load %arg4[%c0_2] : memref<1xf32, #tpu.memory_space<smem>>
    memref.store %1, %arg4[%c0_2] : memref<1xf32, #tpu.memory_space<smem>>
    %c0_3 = arith.constant 0 : index
    %4 = memref.load %arg5[%c0_3] : memref<1xf32, #tpu.memory_space<smem>>
    memref.store %2, %arg5[%c0_3] : memref<1xf32, #tpu.memory_space<smem>>
    %cst = arith.constant 1.000000e+01 : f32
    %5 = arith.mulf %1, %cst : f32
    %cst_4 = arith.constant 5.000000e-01 : f32
    %6 = arith.addf %5, %cst_4 : f32
    %7 = arith.fptosi %6 : f32 to i32
    %c0_i32 = arith.constant 0 : i32
    %c10_i32 = arith.constant 10 : i32
    %8 = arith.maxsi %c0_i32, %7 : i32
    %9 = arith.minsi %c10_i32, %8 : i32
    %c1_i32 = arith.constant 1 : i32
    %10 = arith.cmpi eq, %9, %c1_i32 : i32
    %cst_5 = arith.constant 7.200000e-01 : f32
    %cst_6 = arith.constant 6.600000e-01 : f32
    %11 = arith.select %10, %cst_5, %cst_6 : f32
    %c2_i32 = arith.constant 2 : i32
    %12 = arith.cmpi eq, %9, %c2_i32 : i32
    %cst_7 = arith.constant 0.839999973 : f32
    %13 = arith.select %12, %cst_7, %11 : f32
    %c3_i32 = arith.constant 3 : i32
    %14 = arith.cmpi eq, %9, %c3_i32 : i32
    %cst_8 = arith.constant 0.959999978 : f32
    %15 = arith.select %14, %cst_8, %13 : f32
    %c4_i32 = arith.constant 4 : i32
    %16 = arith.cmpi eq, %9, %c4_i32 : i32
    %cst_9 = arith.constant 1.080000e+00 : f32
    %17 = arith.select %16, %cst_9, %15 : f32
    %c5_i32 = arith.constant 5 : i32
    %18 = arith.cmpi eq, %9, %c5_i32 : i32
    %cst_10 = arith.constant 1.200000e+00 : f32
    %19 = arith.select %18, %cst_10, %17 : f32
    %c6_i32 = arith.constant 6 : i32
    %20 = arith.cmpi eq, %9, %c6_i32 : i32
    %cst_11 = arith.constant 1.320000e+00 : f32
    %21 = arith.select %20, %cst_11, %19 : f32
    %c7_i32 = arith.constant 7 : i32
    %22 = arith.cmpi eq, %9, %c7_i32 : i32
    %cst_12 = arith.constant 1.440000e+00 : f32
    %23 = arith.select %22, %cst_12, %21 : f32
    %c8_i32 = arith.constant 8 : i32
    %24 = arith.cmpi eq, %9, %c8_i32 : i32
    %cst_13 = arith.constant 1.560000e+00 : f32
    %25 = arith.select %24, %cst_13, %23 : f32
    %c9_i32 = arith.constant 9 : i32
    %26 = arith.cmpi eq, %9, %c9_i32 : i32
    %cst_14 = arith.constant 1.680000e+00 : f32
    %27 = arith.select %26, %cst_14, %25 : f32
    %c10_i32_15 = arith.constant 10 : i32
    %28 = arith.cmpi eq, %9, %c10_i32_15 : i32
    %cst_16 = arith.constant 1.800000e+00 : f32
    %29 = arith.select %28, %cst_16, %27 : f32
    %cst_17 = arith.constant 1.000000e+01 : f32
    %30 = arith.mulf %2, %cst_17 : f32
    %cst_18 = arith.constant 5.000000e-01 : f32
    %31 = arith.addf %30, %cst_18 : f32
    %32 = arith.fptosi %31 : f32 to i32
    %c0_i32_19 = arith.constant 0 : i32
    %c10_i32_20 = arith.constant 10 : i32
    %33 = arith.maxsi %c0_i32_19, %32 : i32
    %34 = arith.minsi %c10_i32_20, %33 : i32
    %c1_i32_21 = arith.constant 1 : i32
    %35 = arith.cmpi eq, %34, %c1_i32_21 : i32
    %cst_22 = arith.constant 7.200000e-01 : f32
    %cst_23 = arith.constant 6.600000e-01 : f32
    %36 = arith.select %35, %cst_22, %cst_23 : f32
    %c2_i32_24 = arith.constant 2 : i32
    %37 = arith.cmpi eq, %34, %c2_i32_24 : i32
    %cst_25 = arith.constant 0.839999973 : f32
    %38 = arith.select %37, %cst_25, %36 : f32
    %c3_i32_26 = arith.constant 3 : i32
    %39 = arith.cmpi eq, %34, %c3_i32_26 : i32
    %cst_27 = arith.constant 0.959999978 : f32
    %40 = arith.select %39, %cst_27, %38 : f32
    %c4_i32_28 = arith.constant 4 : i32
    %41 = arith.cmpi eq, %34, %c4_i32_28 : i32
    %cst_29 = arith.constant 1.080000e+00 : f32
    %42 = arith.select %41, %cst_29, %40 : f32
    %c5_i32_30 = arith.constant 5 : i32
    %43 = arith.cmpi eq, %34, %c5_i32_30 : i32
    %cst_31 = arith.constant 1.200000e+00 : f32
    %44 = arith.select %43, %cst_31, %42 : f32
    %c6_i32_32 = arith.constant 6 : i32
    %45 = arith.cmpi eq, %34, %c6_i32_32 : i32
    %cst_33 = arith.constant 1.320000e+00 : f32
    %46 = arith.select %45, %cst_33, %44 : f32
    %c7_i32_34 = arith.constant 7 : i32
    %47 = arith.cmpi eq, %34, %c7_i32_34 : i32
    %cst_35 = arith.constant 1.440000e+00 : f32
    %48 = arith.select %47, %cst_35, %46 : f32
    %c8_i32_36 = arith.constant 8 : i32
    %49 = arith.cmpi eq, %34, %c8_i32_36 : i32
    %cst_37 = arith.constant 1.560000e+00 : f32
    %50 = arith.select %49, %cst_37, %48 : f32
    %c9_i32_38 = arith.constant 9 : i32
    %51 = arith.cmpi eq, %34, %c9_i32_38 : i32
    %cst_39 = arith.constant 1.680000e+00 : f32
    %52 = arith.select %51, %cst_39, %50 : f32
    %c10_i32_40 = arith.constant 10 : i32
    %53 = arith.cmpi eq, %34, %c10_i32_40 : i32
    %cst_41 = arith.constant 1.800000e+00 : f32
    %54 = arith.select %53, %cst_41, %52 : f32
    %55 = arith.cmpf ogt, %0, %54 : f32
    %56 = arith.cmpf ole, %0, %29 : f32
    %c4_i32_42 = arith.constant 4 : i32
    %c5_i32_43 = arith.constant 5 : i32
    %57 = arith.select %56, %c4_i32_42, %c5_i32_43 : i32
    %c8_i32_44 = arith.constant 8 : i32
    %58 = arith.select %55, %c8_i32_44, %57 : i32
    %c0_45 = arith.constant 0 : index
    %59 = memref.load %arg3[%c0_45] : memref<1xi32, #tpu.memory_space<smem>>
    memref.store %58, %arg3[%c0_45] : memref<1xi32, #tpu.memory_space<smem>>
    return
  }
}

</mosaic_0001>

<bundles_post_ra>
// kernel: controller_forward.1
= control target key start
LH: loop header
LB: loop body
LE: loop exit
PB: predicated region body
PF: predicated region fallthrough
CT: control target
= control target key end

     0   :  { %14 = vsyncpa [#allocation6], 0  ;;  %s269_s0 = inlined_call_operand.<no memory space> [shape: f32[1], index: 0, kind: input, shape index: {}]   ;;  %s270_s1 = inlined_call_operand.<no memory space> [shape: f32[1], index: 1, kind: input, shape index: {}, may-alias: {1,4}]   ;;  %s271_s2 = inlined_call_operand.<no memory space> [shape: f32[1], index: 2, kind: input, shape index: {}, may-alias: {2,5}]   ;;  %s272_s3 = inlined_call_operand.hbm [shape: s32[1], index: 3, kind: output, shape index: {0}]   ;;  %s273_s4 = inlined_call_operand.hbm [shape: f32[1], index: 4, kind: output, shape index: {1}, may-alias: {1,4}]   ;;  %s274_s5 = inlined_call_operand.hbm [shape: f32[1], index: 5, kind: output, shape index: {2}, may-alias: {2,5}]  }
   0x1   :  { %15 = vsyncpa [#allocation8], 0  ;;  %26 = sst [smem:[#allocation7]] %s270_s1  ;;  %s180_s20 = smov [#allocation7]  }
   0x2   :  { %104 = dma.smem_to_hbm %s180_s20, 16, %s273_s4, [#allocation8]  }
   0x3   :  { %s29_s25 = smul.f32 10.0, %s270_s1  ;;  %28 = sst [smem:[#allocation9]] %s271_s2 }
   0x4   :  { %s56_s28 = smul.f32 10.0, %s271_s2  ;;  %s181_s16 = smov [#allocation9]  }
   0x5   :  { %s30_s6 = sadd.f32 0.5, %s29_s25  ;;  %s182_s22 = smov [#allocation5]  }
   0x6   :  { %s57_s7 = sadd.f32 0.5, %s56_s28 }
   0x7   :  { %p139_p0 = scmp.lt.s32.totalorder %s30_s6, 0  ;;  %s140_s8 = sceil.f32 %s30_s6 }
   0x8   :  { %s141_s9 = sfloor.f32 %s30_s6  ;;  %p144_p1 = scmp.lt.s32.totalorder %s57_s7, 0 }
   0x9   :  { %s276_s8 = smov (!%p139_p0, %s140_s8), %s141_s9  ;;  %s145_s4 = sceil.f32 %s57_s7 }
   0xa   :  { %s146_s10 = sfloor.f32 %s57_s7  ;;  %s143_s11 = scvt.f32.s32 %s276_s8 }
   0xb   :  { %s278_s4 = smov (!%p144_p1, %s145_s4), %s146_s10 }
   0xc   :  { %p32_p2 = scmp.gt.s32.totalorder %s143_s11, 0  ;;  %p125_p3 = scmp.lt.s32.totalorder %s143_s11, 10 }
   0xd   :  { %s148_s1 = scvt.f32.s32 %s278_s4 }
   0xe   :  { %s280_s11 = smov (!%p32_p2, %s143_s11), 0 }
   0xf   :  { %p59_p4 = scmp.gt.s32.totalorder %s148_s1, 0  ;;  %p130_p5 = scmp.lt.s32.totalorder %s148_s1, 10 }
  0x10   :  { %s282_s11 = smov (!%p125_p3, %s280_s11), 10 }
  0x11   :  { %s60_s2 = scalar_select %p59_p4, %s148_s1, 0 }
  0x12   :  { %p36_p6 = scmp.eq.s32.totalorder %s282_s11, 1  ;;  %p38_p7 = scmp.eq.s32.totalorder %s282_s11, 2 }
  0x13   :  { %p40_p8 = scmp.eq.s32.totalorder %s282_s11, 3  ;;  %p42_p9 = scmp.eq.s32.totalorder %s282_s11, 4 }
  0x14   :  { %s37_s12 = scalar_select %p36_p6, 0.72, 0.66 }
  0x15   :  { %p44_p10 = scmp.eq.s32.totalorder %s282_s11, 5  ;;  %p46_p11 = scmp.eq.s32.totalorder %s282_s11, 6 }
  0x16   :  { %s284_s12 = smov (%p38_p7, %s37_s12), 0.84  ;;  %p48_p12 = scmp.eq.s32.totalorder %s282_s11, 7 }
  0x17   :  { %p50_p13 = scmp.eq.s32.totalorder %s282_s11, 8  ;;  %s286_s12 = smov (%p40_p8, %s284_s12), 0.96 }
  0x18   :  { %p52_p0 = scmp.eq.s32.totalorder %s282_s11, 9  ;;  %p54_p1 = scmp.eq.s32.totalorder %s282_s11, 10 }
  0x19   :  { %s288_s12 = smov (%p42_p9, %s286_s12), 1.08  ;;  %s290_s2 = smov (!%p130_p5, %s60_s2), 10 }
  0x1a   :  { %s292_s12 = smov (%p44_p10, %s288_s12), 1.2  ;;  %p63_p2 = scmp.eq.s32.totalorder %s290_s2, 1 }
  0x1b   :  { %p65_p3 = scmp.eq.s32.totalorder %s290_s2, 2  ;;  %s294_s12 = smov (%p46_p11, %s292_s12), 1.32 }
  0x1c   :  { %s64_s13 = scalar_select %p63_p2, 0.72, 0.66 }
  0x1d   :  { %s296_s12 = smov (%p48_p12, %s294_s12), 1.44  ;;  %p67_p4 = scmp.eq.s32.totalorder %s290_s2, 3 }
  0x1e   :  { %s298_s13 = smov (%p65_p3, %s64_s13), 0.84  ;;  %s300_s12 = smov (%p50_p13, %s296_s12), 1.56 }
  0x1f   :  { %p69_p5 = scmp.eq.s32.totalorder %s290_s2, 4  ;;  %s302_s12 = smov (%p52_p0, %s300_s12), 1.68 }
  0x20   :  { %s304_s13 = smov (%p67_p4, %s298_s13), 0.96  ;;  %s306_s12 = smov (%p54_p1, %s302_s12), 1.8 }
  0x21   :  { %s308_s13 = smov (%p69_p5, %s304_s13), 1.08  ;;  %p71_p6 = scmp.eq.s32.totalorder %s290_s2, 5 }
  0x22   :  { %p73_p7 = scmp.eq.s32.totalorder %s290_s2, 6  ;;  %p75_p8 = scmp.eq.s32.totalorder %s290_s2, 7 }
  0x23   :  { %s310_s13 = smov (%p71_p6, %s308_s13), 1.2  ;;  %p77_p9 = scmp.eq.s32.totalorder %s290_s2, 8 }
  0x24   :  { %s312_s13 = smov (%p73_p7, %s310_s13), 1.32  ;;  %p79_p10 = scmp.eq.s32.totalorder %s290_s2, 9 }
  0x25   :  { %s314_s13 = smov (%p75_p8, %s312_s13), 1.44  ;;  %p81_p11 = scmp.eq.s32.totalorder %s290_s2, 10 }
  0x26   :  { %p84_p12 = scmp.le.f32.partialorder %s269_s0, %s306_s12  ;;  %s316_s13 = smov (%p77_p9, %s314_s13), 1.56 }
  0x27   :  { %112 = dma.smem_to_hbm %s181_s16, 16, %s274_s5, [#allocation8]  }
  0x28   :  { %s318_s13 = smov (%p79_p10, %s316_s13), 1.68 }
  0x29   :  { %s85_s19 = scalar_select %p84_p12, 4, 5 }
  0x2a   :  { %s320_s13 = smov (%p81_p11, %s318_s13), 1.8 }
  0x2b   :  { %p83_p13 = scmp.gt.f32.partialorder %s269_s0, %s320_s13 }
  0x2d   :  { %s322_s19 = smov (%p83_p13, %s85_s19), 8 }
  0x2e   :  { %88 = sst [smem:[#allocation5]] %s322_s19 }
  0x2f   :  { %96 = dma.smem_to_hbm %s182_s22, 16, %s272_s3, [#allocation6]  }
  0x30   :  { %176 = dma.done.wait [#allocation6], 16  }
  0x31   :  { %177 = vsyncadd [#allocation6], 4294967280 }
  0x32   :  { %178 = dma.done.wait [#allocation8], 32  }
  0x33   :  { %179 = vsyncadd [#allocation8], 4294967264 }
  0x34   :  { %122 = sfence }
  0x35   :  { %123 = vsyncpa [#allocation6], 1 }
  0x36   :  { %124 = vsyncpa [#allocation8], 1 }

</bundles_post_ra>
